<compile_context>
chip_gen: v7x
topology: tpu7x:2x2x1
jax: 0.10.0
libtpu: 0.0.40
codegen_flags: <defaults>
</compile_context>

<pallas_src>
import functools

import jax
import jax.numpy as jnp
import numpy as np
from jax.experimental import pallas as pl
from jax.experimental.pallas import tpu as pltpu


# ------------------------------ fused kernel ---------------------------------
def _msf_kernel(x_ref, mats_ref, gate_w_ref, bcast_ref, reduce_ref, params_ref,
                out_ref, w_ref, *, scale_n, eps=1e-5):
    f32 = jnp.float32
    x = x_ref[...]                                   # [TM, S*C]
    w_blk = mats_ref[0]                              # [S*C, S*C] block-diag proj weights
    avg_blk = mats_ref[1]                            # [S*C, S*C] block-averaging (1/C blocks)
    p = params_ref[...]                              # [8, S*C] packed small params
    b_proj = p[0:1, :]
    gamma = p[1:2, :]
    beta = p[2:3, :]
    b_gate = p[3:4, 0:scale_n]                       # [1, S]

    # all S projections in one wide MXU matmul (block-diagonal packed weight)
    h = jnp.dot(x, w_blk, preferred_element_type=f32) + b_proj          # [TM, S*C]

    # per-scale LayerNorm; segment statistics via MXU (no lane slicing / XLU reduces)
    mu = jnp.dot(h, avg_blk, preferred_element_type=f32)                # segment means
    cen = h - mu
    var = jnp.dot(cen * cen, avg_blk, preferred_element_type=f32)       # segment vars
    h_ln = cen * jax.lax.rsqrt(var + eps) * gamma + beta                # [TM, S*C]

    # all S gate Linears (C -> 1) in one matmul; sigmoid + softmax over scales
    logits = jnp.dot(h_ln, gate_w_ref[...], preferred_element_type=f32) + b_gate
    e = jnp.exp(jax.nn.sigmoid(logits))              # no max-shift: sigmoid is in (0,1)
    w = e * pl.reciprocal(jnp.sum(e, axis=-1, keepdims=True), approx=True)  # [TM, S]

    # weighted fusion, lane-wide: broadcast w across each C-segment (MXU), multiply,
    # then sum the S segments with a stacked-identity matmul (MXU)
    w_wide = jnp.dot(w, bcast_ref[...], preferred_element_type=f32)     # [TM, S*C]
    out_ref[...] = jnp.dot(w_wide * h_ln, reduce_ref[...],
                           preferred_element_type=f32)                  # [TM, C]
    w_ref[...] = w                                                      # [TM, S]


# ------------------------------ host wrapper ----------------------------------
def msf_forward(xs, packed, *, row_tile=256):
    """xs: list of S arrays [N, C]. Returns (fused [N, C], weight [S, N, 1])."""
    s = len(xs)
    n, c = xs[0].shape
    sc = s * c
    x_wide = jnp.concatenate(xs, axis=-1)                               # [N, S*C]
    kernel = functools.partial(_msf_kernel, scale_n=s)
    out_shape = (jax.ShapeDtypeStruct((n, c), jnp.float32),
                 jax.ShapeDtypeStruct((n, s), jnp.float32))
    args = (x_wide, packed["mats"], packed["gate_w"], packed["bcast"],
            packed["reduce"], packed["params"])

    if n <= row_tile or n % row_tile != 0:
        # Small / ragged N: single invocation, whole arrays resident in VMEM, no grid
        # (no per-step pipeline bookkeeping, no pointless double buffering).
        vmem = pl.BlockSpec(memory_space=pltpu.MemorySpace.VMEM)
        fused, w = pl.pallas_call(
            kernel,
            out_shape=out_shape,
            in_specs=[vmem] * 6,
            out_specs=(vmem, vmem),
        )(*args)
    else:
        # Large N: row-tiled grid, weights/params stay VMEM-resident (constant index
        # maps); "parallel" lets v7x shard row tiles across its two TensorCores.
        # TODO(synk): for very large N, pack (out | w) into one 128-lane output slab
        # to avoid masked vst on the 32- and 3-lane outputs.
        fused, w = pl.pallas_call(
            kernel,
            out_shape=out_shape,
            grid=(n // row_tile,),
            in_specs=[
                pl.BlockSpec((row_tile, sc), lambda i: (i, 0)),     # x_wide (row-tiled)
                pl.BlockSpec((2, sc, sc), lambda i: (0, 0, 0)),     # proj + averaging mats
                pl.BlockSpec((sc, s), lambda i: (0, 0)),            # packed gate weights
                pl.BlockSpec((s, sc), lambda i: (0, 0)),            # segment-broadcast mat
                pl.BlockSpec((sc, c), lambda i: (0, 0)),            # segment-reduce mat
                pl.BlockSpec((8, sc), lambda i: (0, 0)),            # packed small params
            ],
            out_specs=(pl.BlockSpec((row_tile, c), lambda i: (i, 0)),
                       pl.BlockSpec((row_tile, s), lambda i: (i, 0))),
            compiler_params=pltpu.CompilerParams(
                dimension_semantics=("parallel",)),
        )(*args)

    # match PyTorch: weight.transpose(-2, -1).unsqueeze(-1) -> [S, N, 1]
    weight = jnp.transpose(w)[:, :, None]
    return fused, weight


# ------------------------- parameter init / packing ---------------------------
def init_params(key, c, s):
    """Per-scale params; Linear weights stored in [in, out] layout (y = x @ W + b)."""
    params = []
    for i in range(s):
        k = jax.random.fold_in(key, i)
        k1, k2, k3, k4, k5, k6 = jax.random.split(k, 6)
        params.append(dict(
            w_proj=0.2 * jax.random.normal(k1, (c, c), jnp.float32),
            b_proj=0.1 * jax.random.normal(k2, (c,), jnp.float32),
            gamma=1.0 + 0.1 * jax.random.normal(k3, (c,), jnp.float32),
            beta=0.1 * jax.random.normal(k4, (c,), jnp.float32),
            w_gate=0.2 * jax.random.normal(k5, (c, 1), jnp.float32),
            b_gate=0.05 * jax.random.normal(k6, (1,), jnp.float32),
        ))
    return params


def pack_params(per_scale):
    """Pack per-scale params + structural constant matrices into 5 kernel inputs."""
    s = len(per_scale)
    c = per_scale[0]["w_proj"].shape[0]
    sc = s * c
    w_blk = np.zeros((sc, sc), np.float32)       # block-diag projection weights
    avg_blk = np.zeros((sc, sc), np.float32)     # 1/C in each diagonal CxC block
    gate_w = np.zeros((sc, s), np.float32)       # packed gate Linears (C -> 1)
    bcast = np.zeros((s, sc), np.float32)        # broadcast w[:, i] across segment i
    reduce_m = np.zeros((sc, c), np.float32)     # stacked identity: sum segments
    params = np.zeros((8, sc), np.float32)       # rows: b_proj, gamma, beta, b_gate
    for i, p in enumerate(per_scale):
        lo, hi = i * c, (i + 1) * c
        w_blk[lo:hi, lo:hi] = np.asarray(p["w_proj"])
        avg_blk[lo:hi, lo:hi] = 1.0 / c
        gate_w[lo:hi, i] = np.asarray(p["w_gate"])[:, 0]
        bcast[i, lo:hi] = 1.0
        reduce_m[lo:hi, :] = np.eye(c, dtype=np.float32)
        params[0, lo:hi] = np.asarray(p["b_proj"])
        params[1, lo:hi] = np.asarray(p["gamma"])
        params[2, lo:hi] = np.asarray(p["beta"])
        params[3, i] = float(np.asarray(p["b_gate"])[0])
    mats = np.stack([w_blk, avg_blk], axis=0)    # one [2, S*C, S*C] DMA stream
    return dict(mats=jnp.asarray(mats), gate_w=jnp.asarray(gate_w),
                bcast=jnp.asarray(bcast), reduce=jnp.asarray(reduce_m),
                params=jnp.asarray(params))


# ------------------------------ pure-JAX reference ----------------------------
def msf_ref(xs, per_scale):
    projs, gates = [], []
    for x, p in zip(xs, per_scale):
        h = x @ p["w_proj"] + p["b_proj"]
        mu = h.mean(-1, keepdims=True)
        var = ((h - mu) ** 2).mean(-1, keepdims=True)
        h = (h - mu) / jnp.sqrt(var + 1e-5) * p["gamma"] + p["beta"]
        projs.append(h)
        gates.append(jax.nn.sigmoid(h @ p["w_gate"] + p["b_gate"]))     # [N, 1]
    w = jax.nn.softmax(jnp.concatenate(gates, axis=-1), axis=-1)        # [N, S]
    w_t = jnp.transpose(w)[:, :, None]                                  # [S, N, 1]
    data = jnp.stack(projs, axis=0)                                     # [S, N, C]
    return (data * w_t).sum(0), w_t


# ------------------------------------ main -------------------------------------
if __name__ == "__main__":
    C, S = 32, 3                                         # hidden=32, 3 scales
    key = jax.random.PRNGKey(0)
    k_params, k_x = jax.random.split(key)

    per_scale = init_params(k_params, C, S)
    packed = pack_params(per_scale)

    # --- small case (seq N = 8): grid-free, fully VMEM-resident call -----------
    N = 8
    ks = jax.random.split(k_x, S)
    xs = [jax.random.normal(ks[i], (N, C), jnp.float32) for i in range(S)]
    fused, weight = msf_forward(xs, packed)
    jax.block_until_ready((fused, weight))
    ref_out, ref_w = msf_ref(xs, per_scale)
    np.testing.assert_allclose(np.asarray(fused), np.asarray(ref_out),
                               rtol=5e-2, atol=5e-3)
    np.testing.assert_allclose(np.asarray(weight), np.asarray(ref_w),
                               rtol=5e-2, atol=5e-3)

    # --- larger case (N = 1024): exercises the row-tiled "parallel" grid path --
    N2 = 1024
    ks2 = jax.random.split(jax.random.fold_in(k_x, 7), S)
    xs2 = [jax.random.normal(ks2[i], (N2, C), jnp.float32) for i in range(S)]
    fused2, weight2 = msf_forward(xs2, packed, row_tile=256)
    jax.block_until_ready((fused2, weight2))
    ref_out2, ref_w2 = msf_ref(xs2, per_scale)
    np.testing.assert_allclose(np.asarray(fused2), np.asarray(ref_out2),
                               rtol=5e-2, atol=5e-3)
    np.testing.assert_allclose(np.asarray(weight2), np.asarray(ref_w2),
                               rtol=5e-2, atol=5e-3)

    print("KERNEL_OK")
</pallas_src>

<mosaic_0001>
module attributes {stable_mosaic.version = 11 : i64} {
  func.func @_msf_kernel(%arg0: memref<8x96xf32, #tpu.memory_space<vmem>>, %arg1: memref<2x96x96xf32, #tpu.memory_space<vmem>>, %arg2: memref<96x3xf32, #tpu.memory_space<vmem>>, %arg3: memref<3x96xf32, #tpu.memory_space<vmem>>, %arg4: memref<96x32xf32, #tpu.memory_space<vmem>>, %arg5: memref<8x96xf32, #tpu.memory_space<vmem>>, %arg6: memref<8x32xf32, #tpu.memory_space<vmem>>, %arg7: memref<8x3xf32, #tpu.memory_space<vmem>>) attributes {dimension_semantics = [], scalar_prefetch = 0 : i64, scratch_operands = 0 : i64, tpu.core_type = #tpu.core_type<tc>} {
    %c0 = arith.constant 0 : index
    %c0_0 = arith.constant 0 : index
    %0 = vector.load %arg0[%c0, %c0_0] : memref<8x96xf32, #tpu.memory_space<vmem>>, vector<8x96xf32>
    %c0_1 = arith.constant 0 : index
    %c0_2 = arith.constant 0 : index
    %c0_3 = arith.constant 0 : index
    %1 = vector.load %arg1[%c0_1, %c0_2, %c0_3] : memref<2x96x96xf32, #tpu.memory_space<vmem>>, vector<1x96x96xf32>
    %2 = vector.shape_cast %1 : vector<1x96x96xf32> to vector<96x96xf32>
    %c1 = arith.constant 1 : index
    %c0_4 = arith.constant 0 : index
    %c0_5 = arith.constant 0 : index
    %3 = vector.load %arg1[%c1, %c0_4, %c0_5] : memref<2x96x96xf32, #tpu.memory_space<vmem>>, vector<1x96x96xf32>
    %4 = vector.shape_cast %3 : vector<1x96x96xf32> to vector<96x96xf32>
    %c0_6 = arith.constant 0 : index
    %c0_7 = arith.constant 0 : index
    %5 = vector.load %arg5[%c0_6, %c0_7] : memref<8x96xf32, #tpu.memory_space<vmem>>, vector<8x96xf32>
    %6 = vector.extract_strided_slice %5 {offsets = [0, 0], sizes = [1, 96], strides = [1, 1]} : vector<8x96xf32> to vector<1x96xf32>
    %7 = vector.extract_strided_slice %5 {offsets = [1, 0], sizes = [1, 96], strides = [1, 1]} : vector<8x96xf32> to vector<1x96xf32>
    %8 = vector.extract_strided_slice %5 {offsets = [2, 0], sizes = [1, 96], strides = [1, 1]} : vector<8x96xf32> to vector<1x96xf32>
    %9 = vector.extract_strided_slice %5 {offsets = [3, 0], sizes = [1, 3], strides = [1, 1]} : vector<8x96xf32> to vector<1x3xf32>
    %cst = arith.constant dense<0.000000e+00> : vector<8x96xf32>
    %10 = tpu.matmul %0, %2, %cst {dimension_numbers = #tpu.dot_dimension_numbers<[1], [0], [0], [1], [0, 0, 1, 1], [], []>} : vector<8x96xf32>, vector<96x96xf32>, vector<8x96xf32> -> vector<8x96xf32>
    %11 = vector.broadcast %6 : vector<1x96xf32> to vector<8x96xf32>
    %12 = arith.addf %10, %11 : vector<8x96xf32>
    %cst_8 = arith.constant dense<0.000000e+00> : vector<8x96xf32>
    %13 = tpu.matmul %12, %4, %cst_8 {dimension_numbers = #tpu.dot_dimension_numbers<[1], [0], [0], [1], [0, 0, 1, 1], [], []>} : vector<8x96xf32>, vector<96x96xf32>, vector<8x96xf32> -> vector<8x96xf32>
    %14 = arith.subf %12, %13 : vector<8x96xf32>
    %15 = arith.mulf %14, %14 : vector<8x96xf32>
    %cst_9 = arith.constant dense<0.000000e+00> : vector<8x96xf32>
    %16 = tpu.matmul %15, %4, %cst_9 {dimension_numbers = #tpu.dot_dimension_numbers<[1], [0], [0], [1], [0, 0, 1, 1], [], []>} : vector<8x96xf32>, vector<96x96xf32>, vector<8x96xf32> -> vector<8x96xf32>
    %cst_10 = arith.constant 9.99999974E-6 : f32
    %17 = vector.broadcast %cst_10 : f32 to vector<8x96xf32>
    %18 = arith.addf %16, %17 : vector<8x96xf32>
    %19 = math.rsqrt %18 : vector<8x96xf32>
    %20 = arith.mulf %14, %19 : vector<8x96xf32>
    %21 = vector.broadcast %7 : vector<1x96xf32> to vector<8x96xf32>
    %22 = arith.mulf %20, %21 : vector<8x96xf32>
    %23 = vector.broadcast %8 : vector<1x96xf32> to vector<8x96xf32>
    %24 = arith.addf %22, %23 : vector<8x96xf32>
    %c0_11 = arith.constant 0 : index
    %c0_12 = arith.constant 0 : index
    %25 = vector.load %arg2[%c0_11, %c0_12] : memref<96x3xf32, #tpu.memory_space<vmem>>, vector<96x3xf32>
    %cst_13 = arith.constant dense<0.000000e+00> : vector<8x3xf32>
    %26 = tpu.matmul %24, %25, %cst_13 {dimension_numbers = #tpu.dot_dimension_numbers<[1], [0], [0], [1], [0, 0, 1, 1], [], []>} : vector<8x96xf32>, vector<96x3xf32>, vector<8x3xf32> -> vector<8x3xf32>
    %27 = vector.broadcast %9 : vector<1x3xf32> to vector<8x3xf32>
    %28 = arith.addf %26, %27 : vector<8x3xf32>
    %29 = arith.negf %28 : vector<8x3xf32>
    %30 = math.exp %29 : vector<8x3xf32>
    %cst_14 = arith.constant 1.000000e+00 : f32
    %31 = vector.broadcast %cst_14 : f32 to vector<8x3xf32>
    %32 = arith.addf %31, %30 : vector<8x3xf32>
    %33 = arith.divf %31, %32 : vector<8x3xf32>
    %34 = math.exp %33 : vector<8x3xf32>
    %cst_15 = arith.constant dense<0.000000e+00> : vector<8xf32>
    %35 = vector.multi_reduction <add>, %34, %cst_15 [1] : vector<8x3xf32> to vector<8xf32>
    %36 = vector.shape_cast %35 : vector<8xf32> to vector<8x1xf32>
    %37 = tpu.reciprocal %36 {approx = true} : vector<8x1xf32> -> vector<8x1xf32>
    %38 = vector.broadcast %37 : vector<8x1xf32> to vector<8x3xf32>
    %39 = arith.mulf %34, %38 : vector<8x3xf32>
    %c0_16 = arith.constant 0 : index
    %c0_17 = arith.constant 0 : index
    %40 = vector.load %arg3[%c0_16, %c0_17] : memref<3x96xf32, #tpu.memory_space<vmem>>, vector<3x96xf32>
    %cst_18 = arith.constant dense<0.000000e+00> : vector<8x96xf32>
    %41 = tpu.matmul %39, %40, %cst_18 {dimension_numbers = #tpu.dot_dimension_numbers<[1], [0], [0], [1], [0, 0, 1, 1], [], []>} : vector<8x3xf32>, vector<3x96xf32>, vector<8x96xf32> -> vector<8x96xf32>
    %42 = arith.mulf %41, %24 : vector<8x96xf32>
    %c0_19 = arith.constant 0 : index
    %c0_20 = arith.constant 0 : index
    %43 = vector.load %arg4[%c0_19, %c0_20] : memref<96x32xf32, #tpu.memory_space<vmem>>, vector<96x32xf32>
    %cst_21 = arith.constant dense<0.000000e+00> : vector<8x32xf32>
    %44 = tpu.matmul %42, %43, %cst_21 {dimension_numbers = #tpu.dot_dimension_numbers<[1], [0], [0], [1], [0, 0, 1, 1], [], []>} : vector<8x96xf32>, vector<96x32xf32>, vector<8x32xf32> -> vector<8x32xf32>
    %c0_22 = arith.constant 0 : index
    %c0_23 = arith.constant 0 : index
    %45 = vector.load %arg6[%c0_22, %c0_23] : memref<8x32xf32, #tpu.memory_space<vmem>>, vector<8x32xf32>
    tpu.vector_store %arg6[%c0_22, %c0_23], %44 {strides = array<i32>} : memref<8x32xf32, #tpu.memory_space<vmem>>, vector<8x32xf32>,
    %c0_24 = arith.constant 0 : index
    %c0_25 = arith.constant 0 : index
    %46 = vector.load %arg7[%c0_24, %c0_25] : memref<8x3xf32, #tpu.memory_space<vmem>>, vector<8x3xf32>
    tpu.vector_store %arg7[%c0_24, %c0_25], %39 {strides = array<i32>} : memref<8x3xf32, #tpu.memory_space<vmem>>, vector<8x3xf32>,
    return
  }
}

</mosaic_0001>

<bundles_post_ra>
// kernel: tpu_custom_call.1
= control target key start
LH: loop header
LB: loop body
LE: loop exit
PB: predicated region body
PF: predicated region fallthrough
CT: control target
= control target key end

     0   :  { %13 = vsyncpa [#allocation3], 0  ;;  %s1245_s0 = inlined_call_operand.vmem [shape: f32[8,96], index: 0, kind: input, shape index: {}]   ;;  %s1246_s1 = inlined_call_operand.vmem [shape: f32[2,96,96], index: 1, kind: input, shape index: {}]   ;;  %s1247_s2 = inlined_call_operand.vmem [shape: f32[96,3], index: 2, kind: input, shape index: {}]   ;;  %s1248_s3 = inlined_call_operand.hbm [shape: f32[3,96], index: 3, kind: input, shape index: {}]   ;;  %s1249_s4 = inlined_call_operand.vmem [shape: f32[96,32], index: 4, kind: input, shape index: {}]   ;;  %s1250_s5 = inlined_call_operand.vmem [shape: f32[8,96], index: 5, kind: input, shape index: {}]   ;;  %s1251_s6 = inlined_call_operand.hbm [shape: f32[8,32], index: 6, kind: output, shape index: {0}]   ;;  %s1252_s7 = inlined_call_operand.vmem [shape: f32[8,3], index: 7, kind: output, shape index: {1}]  }
   0x1   :  { %14 = vsyncpa [#allocation4], 0  ;;  %s972_s24 = smov [#allocation2]   ;;  %s924_s28 = scalar_lea.hbm %s1248_s3, 64 }
   0x2   :  { %s27_s25 = sshll.u32 %s972_s24, 4  ;;  %p925_p0 = scmp.ne.s32.totalorder %s1248_s3, %s924_s28  ;;  %s28_s25 = int_to_ptr.vmem [resolvable:$true] %s27_s25 }
   0x3   :  { %p928_p1 = scmp.lt.u32.totalorder %s924_s28, %s1248_s3 }
   0x5   :  { %p930_p2 = pnand %p928_p1, %p925_p0 }
   0x7   :  { %933 = shalt.err (!%p930_p2)
}
   0x8   :  { %s934_s10 = scalar_lea.vmem %s28_s25, 64  ;;  %p939_p4 = scmp.lt.s32.totalorder %s28_s25, %s28_s25 }
   0x9   :  { %p935_p3 = scmp.ne.s32.totalorder %s28_s25, %s934_s10  ;;  %p940_p5 = scmp.lt.s32.totalorder %s934_s10, %s934_s10 }
   0xb   :  { %p941_p6 = por %p940_p5, %p939_p4 }
   0xd   :  { %p942_p7 = pnand %p941_p6, %p935_p3 }
   0xf   :  { %945 = shalt.err (!%p942_p7)
}
  0x10   :  { %30 = dma.hbm_to_vmem [thread:$0]  %s1248_s3, 64, %s28_s25, [#allocation3]  }
  0x11   :  { %968 = dma.done.wait [#allocation3], 64  }
  0x12   :  { %969 = vsyncadd [#allocation3], 4294967232  ;;  %v973_v0 = vmov 0.0|0.0   ;;  %vm974_vm0 = vmmov 0   ;;  %v975_v1 = vmov 0.0   ;;  %v39_v2 = vld [vmem:[%s1246_s1] sm:$0xff]  ;;  %v65_v39 = vlaneseq }
  0x13   :  { %819 = vmatprep.subr.bf16.mxu0 %v973_v0  ;;  %703 = vmatprep.mubr.msk.f32.mxu0 %vm974_vm0, %v975_v1  ;;  %v40_v3 = vld [vmem:[%s1246_s1 + $0x8] sm:$0xff]  ;;  %v41_v4 = vld [vmem:[%s1246_s1 + $0x10] sm:$0xff]  ;;  %v42_v6 = vld [vmem:[%s1246_s1 + $0x18] sm:$0xff]  ;;  %vm69_vm1 = vcmask 785408   ;;  %vm400_vm2 = vcmask 23552   ;;  %vm410_vm3 = vcmask 1042432  }
  0x14   :  { %837 = vmatprep.subr.bf16.mxu1 %v973_v0  ;;  %730 = vmatprep.mubr.msk.f32.mxu1 %vm974_vm0, %v975_v1  ;;  %v820_v5 = vpack.c.bf16 %v40_v3, %v39_v2  ;;  %v823_v7 = vpack.c.bf16 %v42_v6, %v41_v4  ;;  %v43_v8 = vld [vmem:[%s1246_s1 + $0x20] sm:$0xff]  ;;  %v44_v9 = vld [vmem:[%s1246_s1 + $0x28] sm:$0xff]  ;;  %v594_v13 = vld [vmem:[%s1246_s1 + $0x70] sm:$0xff]  ;;  %v66_v40 = vshrl.u32 %v65_v39, 7  ;;  %s976_s11 = smov [#allocation5]   ;;  %vm570_vm4 = vcmask 261120  }
  0x15   :  { %v592_v10 = vld [vmem:[%s1246_s1 + $0x60] sm:$0xff]  ;;  %v593_v11 = vld [vmem:[%s1246_s1 + $0x68] sm:$0xff]  ;;  %v595_v14 = vld [vmem:[%s1246_s1 + $0x78] sm:$0xff]  ;;  %v826_v15 = vpack.c.bf16 %v44_v9, %v43_v8  ;;  %s579_s12 = sshll.u32 %s976_s11, 4  ;;  %s580_s12 = int_to_ptr.vmem [resolvable:$true] %s579_s12 }
  0x16   :  { %821 = vmatpush3.bf16.msra.mxu0 %v820_v5  ;;  %v838_v12 = vpack.c.bf16 %v593_v11, %v592_v10  ;;  %v45_v16 = vld [vmem:[%s1246_s1 + $0x30] sm:$0xff]  ;;  %v841_v17 = vpack.c.bf16 %v595_v14, %v594_v13  ;;  %v46_v18 = vld [vmem:[%s1246_s1 + $0x38] sm:$0xff]  ;;  %v596_v19 = vld [vmem:[%s1246_s1 + $0x80] sm:$0xff]  ;;  %v67_v41 = vsub.s32 0, %v66_v40  ;;  %v295_v10 = vsub.s32 1, %v66_v40  ;;  %p951_p9 = scmp.lt.s32.totalorder %s580_s12, %s580_s12 }
  0x17   :  { %822 = vmatprep.subr.bf16.mxu0 %v973_v0  ;;  %v597_v20 = vld [vmem:[%s1246_s1 + $0x88] sm:$0xff]  ;;  %v829_v21 = vpack.c.bf16 %v46_v18, %v45_v16  ;;  %v47_v22 = vld [vmem:[%s1246_s1 + $0x40] sm:$0xff]  ;;  %v598_v25 = vld [vmem:[%s1246_s1 + $0x90] sm:$0xff]  ;;  %v300_v11 = vsub.s32 2, %v66_v40  ;;  %v317_v18 = vsub.s32 3, %v66_v40 }
  0x18   :  { %839 = vmatpush3.bf16.msra.mxu1 %v838_v12  ;;  %v844_v23 = vpack.c.bf16 %v597_v20, %v596_v19  ;;  %v48_v24 = vld [vmem:[%s1246_s1 + $0x48] sm:$0xff]  ;;  %v599_v26 = vld [vmem:[%s1246_s1 + $0x98] sm:$0xff]  ;;  %v49_v28 = vld [vmem:[%s1246_s1 + $0x50] sm:$0xff] }
  0x19   :  { %840 = vmatprep.subr.bf16.mxu1 %v973_v0  ;;  %v832_v27 = vpack.c.bf16 %v48_v24, %v47_v22  ;;  %v847_v29 = vpack.c.bf16 %v599_v26, %v598_v25  ;;  %v50_v30 = vld [vmem:[%s1246_s1 + $0x58] sm:$0xff]  ;;  %v600_v31 = vld [vmem:[%s1246_s1 + $0xa0] sm:$0xff]  ;;  %v601_v32 = vld [vmem:[%s1246_s1 + $0xa8] sm:$0xff] }
  0x1a   :  { %824 = vmatpush3.bf16.msra.mxu0 %v823_v7  ;;  %v835_v33 = vpack.c.bf16 %v50_v30, %v49_v28  ;;  %v850_v34 = vpack.c.bf16 %v601_v32, %v600_v31  ;;  %v38_v35 = vld [vmem:[%s1245_s0] sm:$0xff]  ;;  %v602_v36 = vld [vmem:[%s1246_s1 + $0xb0] sm:$0xff]  ;;  %v603_v37 = vld [vmem:[%s1246_s1 + $0xb8] sm:$0xff] }
  0x1b   :  { %825 = vmatprep.subr.bf16.mxu0 %v973_v0  ;;  %v853_v38 = vpack.c.bf16 %v603_v37, %v602_v36  ;;  %v64_v42 = vld [vmem:[%s1250_s5] sm:$0xff]  ;;  %v304_v48 = vld [vmem:[%s1247_s2 + $0x8] sm:$0xff]  ;;  %v305_v54 = vld [vmem:[%s1247_s2 + $0x10] sm:$0xff] }
  0x1c   :  { %842 = vmatpush3.bf16.msra.mxu1 %v841_v17  ;;  %v68_v43 = vrot.slane %v64_v42, %v67_v41  ;;  %v303_v47 = vld [vmem:[%s1247_s2] sm:$0xff]  ;;  %v306_v55 = vld [vmem:[%s1247_s2 + $0x18] sm:$0xff]  ;;  %v308_v58 = vld [vmem:[%s1247_s2 + $0x28] sm:$0xff]  ;;  %v301_v14 = vrot.slane %v64_v42, %v300_v11  ;;  %v318_v19 = vrot.slane %v64_v42, %v317_v18 }
  0x1d   :  { %843 = vmatprep.subr.bf16.mxu1 %v973_v0  ;;  %v874_v49 = vpack.c.bf16 %v304_v48, %v303_v47  ;;  %v877_v56 = vpack.c.bf16 %v306_v55, %v305_v54  ;;  %v307_v57 = vld [vmem:[%s1247_s2 + $0x20] sm:$0xff]  ;;  %v309_v60 = vld [vmem:[%s1247_s2 + $0x30] sm:$0xff]  ;;  %v310_v61 = vld [vmem:[%s1247_s2 + $0x38] sm:$0xff] }
  0x1e   :  { %827 = vmatpush3.bf16.msra.mxu0 %v826_v15  ;;  %v880_v59 = vpack.c.bf16 %v308_v58, %v307_v57  ;;  %v883_v62 = vpack.c.bf16 %v310_v61, %v309_v60  ;;  %v311_v63 = vld [vmem:[%s1247_s2 + $0x40] sm:$0xff]  ;;  %v312_v2 = vld [vmem:[%s1247_s2 + $0x48] sm:$0xff]  ;;  %v313_v4 = vld [vmem:[%s1247_s2 + $0x50] sm:$0xff] }
  0x1f   :  { %828 = vmatprep.subr.bf16.mxu0 %v973_v0  ;;  %v886_v3 = vpack.c.bf16 %v312_v2, %v311_v63  ;;  %v314_v5 = vld [vmem:[%s1247_s2 + $0x58] sm:$0xff]  ;;  %v406_v30 = vld [vmem:[#allocation2] sm:$0x7]  ;;  %v486_v31 = vld [vmem:[%s1249_s4 + $0x8] sm:$0xff] }
  0x20   :  { %845 = vmatpush3.bf16.msra.mxu1 %v844_v23  ;;  %v889_v6 = vpack.c.bf16 %v314_v5, %v313_v4  ;;  %v487_v32 = vld [vmem:[%s1249_s4 + $0x10] sm:$0xff]  ;;  %v489_v36 = vld [vmem:[%s1249_s4 + $0x20] sm:$0xff]  ;;  %v490_v37 = vld [vmem:[%s1249_s4 + $0x28] sm:$0xff] }
  0x21   :  { %846 = vmatprep.subr.bf16.mxu1 %v973_v0  ;;  %v491_v39 = vld [vmem:[%s1249_s4 + $0x30] sm:$0xff]  ;;  %v492_v40 = vld [vmem:[%s1249_s4 + $0x38] sm:$0xff] }
  0x22   :  { %830 = vmatpush3.bf16.msra.mxu0 %v829_v21  ;;  %v901_v41 = vpack.c.bf16 %v492_v40, %v491_v39  ;;  %v495_v48 = vld [vmem:[%s1249_s4 + $0x50] sm:$0xff] }
  0x23   :  { %831 = vmatprep.subr.bf16.mxu0 %v973_v0 }
  0x24   :  { %848 = vmatpush3.bf16.msra.mxu1 %v847_v29 }
  0x25   :  { %849 = vmatprep.subr.bf16.mxu1 %v973_v0 }
  0x26   :  { %833 = vmatpush3.bf16.msra.mxu0 %v832_v27 }
  0x27   :  { %834 = vmatprep.subr.bf16.mxu0 %v973_v0 }
  0x28   :  { %851 = vmatpush3.bf16.msra.mxu1 %v850_v34 }
  0x29   :  { %852 = vmatprep.subr.bf16.mxu1 %v973_v0 }
  0x2a   :  { %836 = vmatpush3.bf16.msra.mxu0 %v835_v33 }
  0x2b   :  { %855 = vmatprep.subr.bf16.mxu0 %v973_v0 }
  0x2c   :  { %854 = vmatpush3.bf16.msra.mxu1 %v853_v38 }
  0x2d   :  { %704 = vmatmul.mubr.msk.f32.vlgmr.msra.gmra.mrb[0].mxu0 %vm69_vm1, %v38_v35  ;;  %873 = vmatprep.subr.bf16.mxu1 %v973_v0 }
  0x2e   :  { %857 = vmatpush3.bf16.msra.mxu0 %v838_v12  ;;  %757 = vmatprep.mubr.msk.f32.mxu0 %vm974_vm0, %v975_v1  ;;  %v296_v12 = vrot.slane %v64_v42, %v295_v10  ;;  %v493_v42 = vld [vmem:[%s1249_s4 + $0x40] sm:$0xff] }
  0x2f   :  { %858 = vmatprep.subr.bf16.mxu0 %v973_v0 }
  0x32   :  { %860 = vmatpush3.bf16.msra.mxu0 %v841_v17 }
  0x33   :  { %861 = vmatprep.subr.bf16.mxu0 %v973_v0 }
  0x36   :  { %863 = vmatpush3.bf16.msra.mxu0 %v844_v23 }
  0x37   :  { %864 = vmatprep.subr.bf16.mxu0 %v973_v0 }
  0x3a   :  { %866 = vmatpush3.bf16.msra.mxu0 %v847_v29 }
  0x3b   :  { %867 = vmatprep.subr.bf16.mxu0 %v973_v0 }
  0x3e   :  { %869 = vmatpush3.bf16.msra.mxu0 %v850_v34  ;;  %v488_v34 = vld [vmem:[%s1249_s4 + $0x18] sm:$0xff] }
  0x3f   :  { %870 = vmatprep.subr.bf16.mxu0 %v973_v0  ;;  %v895_v35 = vpack.c.bf16 %v488_v34, %v487_v32 }
  0x42   :  { %872 = vmatpush3.bf16.msra.mxu0 %v853_v38  ;;  %v898_v38 = vpack.c.bf16 %v490_v37, %v489_v36 }
  0x43   :  { %787 = vmatprep.subr.mxu0 %v975_v1 }
 0x100   :  { %v139_v44 = vpop.f32.mrb[0].mxu0 }
 0x101   :  { %v140_v45 = vadd.f32 %v139_v44, %v68_v43  ;;  %v705_v46 = vpop.f32.mrb[1].mxu0  ;;  %v494_v43 = vld [vmem:[%s1249_s4 + $0x48] sm:$0xff] }
 0x102   :  { %v904_v44 = vpack.c.bf16 %v494_v43, %v493_v42 }
 0x103   :  { %731 = vmatmul.mubr.msk.f32.vlgmr.msra.gmra.mrb[0].mxu1 %vm69_vm1, %v140_v45 }
 0x104   :  { %784 = vmatprep.mubr.msk.f32.mxu1 %vm974_vm0, %v975_v1  ;;  %875 = vmatpush3.bf16.msra.mxu1 %v874_v49  ;;  %v496_v49 = vld [vmem:[%s1249_s4 + $0x58] sm:$0xff] }
 0x105   :  { %876 = vmatprep.subr.bf16.mxu1 %v973_v0 }
 0x108   :  { %878 = vmatpush3.bf16.msra.mxu1 %v877_v56 }
 0x109   :  { %879 = vmatprep.subr.bf16.mxu1 %v973_v0 }
 0x10c   :  { %881 = vmatpush3.bf16.msra.mxu1 %v880_v59 }
 0x10d   :  { %882 = vmatprep.subr.bf16.mxu1 %v973_v0 }
 0x110   :  { %884 = vmatpush3.bf16.msra.mxu1 %v883_v62 }
 0x111   :  { %885 = vmatprep.subr.bf16.mxu1 %v973_v0 }
 0x114   :  { %887 = vmatpush3.bf16.msra.mxu1 %v886_v3 }
 0x115   :  { %888 = vmatprep.subr.bf16.mxu1 %v973_v0 }
 0x118   :  { %890 = vmatpush3.bf16.msra.mxu1 %v889_v6 }
 0x119   :  { %891 = vmatprep.subr.bf16.mxu1 %v973_v0 }
 0x1d6   :  { %v212_v50 = vpop.f32.mrb[0].mxu1 }
 0x1d7   :  { %v216_v51 = vsub.f32 %v140_v45, %v212_v50  ;;  %v732_v52 = vpop.f32.mrb[1].mxu1 }
 0x1d9   :  { %v217_v53 = vmul.f32 %v216_v51, %v216_v51 }
 0x1db   :  { %758 = vmatmul.mubr.msk.f32.vlgmr.msra.gmra.mrb[2].mxu0 %vm69_vm1, %v217_v53 }
 0x1dc   :  { %789 = vmatprep.mubr.msk.f32.mxu0 %vm974_vm0, %v975_v1  ;;  %788 = vmatpush3.msk.msra.mxu0 %vm410_vm3, %v406_v30 }
 0x2ae   :  { %v287_v7 = vpop.f32.mrb[2].mxu0 }
 0x2af   :  { %v288_v8 = vadd.f32 1e-05, %v287_v7  ;;  %v759_v9 = vpop.f32.mrb[3].mxu0 }
 0x2b1   :  { %914 = vrsqrt.f32 %v288_v8 }
 0x2bb   :  { %v915_v13 = vpop.eup %914 }
 0x2bc   :  { %v292_v15 = vmul.f32 %v915_v13, %v216_v51 }
 0x2be   :  { %v297_v16 = vmul.f32 %v296_v12, %v292_v15 }
 0x2c0   :  { %v302_v17 = vadd.f32 %v301_v14, %v297_v16 }
 0x2c2   :  { %785 = vmatmul.mubr.msk.f32.vlgmr.msra.gmra.mrb[2].mxu1 %vm69_vm1, %v302_v17 }
 0x2c3   :  { %816 = vmatprep.mubr.msk.f32.mxu1 %vm974_vm0, %v975_v1  ;;  %v485_v1 = vld [vmem:[%s1249_s4] sm:$0xff] }
 0x2c4   :  { %v892_v33 = vpack.c.bf16 %v486_v31, %v485_v1 }
 0x2c6   :  { %893 = vmatpush3.bf16.msra.mxu1 %v892_v33 }
 0x2c7   :  { %894 = vmatprep.subr.bf16.mxu1 %v973_v0 }
 0x2ca   :  { %896 = vmatpush3.bf16.msra.mxu1 %v895_v35 }
 0x2cb   :  { %897 = vmatprep.subr.bf16.mxu1 %v973_v0 }
 0x2ce   :  { %899 = vmatpush3.bf16.msra.mxu1 %v898_v38 }
 0x2cf   :  { %900 = vmatprep.subr.bf16.mxu1 %v973_v0 }
 0x2d2   :  { %902 = vmatpush3.bf16.msra.mxu1 %v901_v41 }
 0x2d3   :  { %903 = vmatprep.subr.bf16.mxu1 %v973_v0 }
 0x2d6   :  { %905 = vmatpush3.bf16.msra.mxu1 %v904_v44 }
 0x2d7   :  { %906 = vmatprep.subr.bf16.mxu1 %v973_v0  ;;  %v907_v0 = vpack.c.bf16 %v496_v49, %v495_v48 }
 0x2da   :  { %908 = vmatpush3.bf16.msra.mxu1 %v907_v0 }
 0x395   :  { %v388_v20 = vpop.f32.mrb[2].mxu1 }
 0x396   :  { %v389_v21 = vadd.f32 %v388_v20, %v318_v19  ;;  %v786_v22 = vpop.f32.mrb[3].mxu1 }
 0x398   :  { %v608_v23 = vmul.f32 -1.442695, %v389_v21 }
 0x39a   :  { %916 = vpow2.f32 %v608_v23 }
 0x3a4   :  { %v917_v24 = vpop.eup %916 }
 0x3a5   :  { %v395_v25 = vadd.f32 1.0, %v917_v24 }
 0x3a7   :  { %918 = vrcp.f32 %v395_v25 }
 0x3b1   :  { %v919_v26 = vpop.eup %918 }
 0x3b2   :  { %v398_v27 = vmul.f32 1.442695, %v919_v26 }
 0x3b4   :  { %920 = vpow2.f32 %v398_v27 }
 0x3be   :  { %v921_v28 = vpop.eup %920 }
 0x3bf   :  { %v401_v29 = vsel %vm400_vm2, %v921_v28, 0.0 }
 0x3c0   :  { %402 = vadd.xlane.f32.xlu0 %v401_v29 }
 0x44d   :  { %v403_v45 = vpop.xlane.xlu0 %402 }
 0x44e   :  { %922 = vrcp.f32 %v403_v45 }
 0x458   :  { %v923_v46 = vpop.eup %922 }
 0x459   :  { %v405_v47 = vmul.f32 %v923_v46, %v921_v28 }
 0x45b   :  { %572 = vst.msk [vmem:[%s1252_s7] sm:$0xff] %vm400_vm2, %v405_v47  ;;  %790 = vmatmul.mubr.msk.f32.vlgmr.msra.gmra.mrb[4].mxu0 %vm400_vm2, %v405_v47  ;;  %s946_s7 = scalar_lea.vmem %s580_s12, 128 }
 0x45c   :  { %p947_p8 = scmp.ne.s32.totalorder %s580_s12, %s946_s7  ;;  %p952_p10 = scmp.lt.s32.totalorder %s946_s7, %s946_s7 }
 0x45e   :  { %p953_p11 = por %p952_p10, %p951_p9 }
 0x460   :  { %p954_p12 = pnand %p953_p11, %p947_p8 }
 0x52e   :  { %v480_v50 = vpop.f32.mrb[4].mxu0 }
 0x52f   :  { %v484_v51 = vmul.f32 %v480_v50, %v302_v17  ;;  %v791_v52 = vpop.f32.mrb[5].mxu0 }
 0x531   :  { %817 = vmatmul.mubr.msk.f32.vlgmr.msra.gmra.mrb[4].mxu1 %vm69_vm1, %v484_v51 }
 0x604   :  { %v566_v53 = vpop.f32.mrb[4].mxu1 }
 0x605   :  { %v818_v54 = vpop.f32.mrb[5].mxu1  ;;  %571 = vst.msk [vmem:[#allocation5] sm:$0xff] %vm570_vm4, %v566_v53 }
 0x606   :  { %957 = shalt.err (!%p954_p12)
}
 0x607   :  { %s958_s13 = scalar_lea.hbm %s1251_s6, 128 }
 0x608   :  { %p959_p13 = scmp.ne.s32.totalorder %s1251_s6, %s958_s13  ;;  %p962_p0 = scmp.lt.u32.totalorder %s958_s13, %s1251_s6 }
 0x60a   :  { %p964_p1 = pnand %p962_p0, %p959_p13 }
 0x60c   :  { %967 = shalt.err (!%p964_p1)
}
 0x60d   :  { %582 = dma.vmem_to_hbm [thread:$0]  %s580_s12, 128, %s1251_s6, [#allocation4]  }
 0x60e   :  { %970 = dma.done.wait [#allocation4], 128  }
 0x60f   :  { %971 = vsyncadd [#allocation4], 4294967168 }
 0x610   :  { %590 = vsyncpa [#allocation3], 1 }
 0x611   :  { %591 = vsyncpa [#allocation4], 1 }

</bundles_post_ra>
